<compile_context>
chip_gen: v7x
topology: tpu7x:2x2x1
jax: 0.10.0
libtpu: 0.0.40
codegen_flags: <defaults>
</compile_context>

<pallas_src>
import functools
import math

import jax
import jax.numpy as jnp
from jax import lax
from jax.experimental import pallas as pl
from jax.experimental.pallas import tpu as pltpu


# ----------------------------------------------------------------------------
# Helpers
# ----------------------------------------------------------------------------
def _pick_block(total, target):
    """Largest convenient tile: `target` if it divides `total`, else the full extent."""
    if total <= target or total % target != 0:
        return total
    return target


def _vmem_limit_bytes():
    """Scoped-VMEM budget: physical capacity minus headroom, capped (v7x≈48MiB, v5e/v6e 100MiB)."""
    try:
        cap = pltpu.get_tpu_info().vmem_capacity_bytes
    except Exception:
        cap = 64 * 1024 * 1024
    return int(min(max(cap - 16 * 1024 * 1024, 32 * 1024 * 1024), 100 * 1024 * 1024))


# ----------------------------------------------------------------------------
# Kernel 1: fused QKV projection (single MXU matmul over all heads, scale pre-folded into Wq)
# ----------------------------------------------------------------------------
def _qkv_proj_kernel(x_ref, w_ref, o_ref):
    # x_ref: (1, Tm, E)   w_ref: (E, 3*H*hs)   o_ref: (1, Tm, 3*H*hs)
    o_ref[0] = jnp.dot(
        x_ref[0], w_ref[...], preferred_element_type=jnp.float32
    ).astype(o_ref.dtype)


# ----------------------------------------------------------------------------
# Kernel 2: flash-style causal MHA over pre-projected, head-major Q/K/V
# ----------------------------------------------------------------------------
def _flash_mhsa_kernel(q_ref, k_ref, v_ref, o_ref, m_scr, l_scr, acc_scr,
                       *, block_q, block_k, num_heads, head_size):
    # q_ref   : (1, H, Tq, hs)  resident query tile (bf16 or f32)
    # k_ref/v_ref: (1, H, Tk, hs) streamed kv tiles
    # o_ref   : (1, Tq, H*hs)   lane-dense concatenated-head output tile
    # scratch : m_scr/l_scr (H, Tq, 1) f32, acc_scr (H, Tq, hs) f32
    qi = pl.program_id(1)
    ki = pl.program_id(2)
    q_start = qi * block_q
    k_start = ki * block_k

    @pl.when(ki == 0)
    def _init():
        m_scr[...] = jnp.full(m_scr.shape, -1e30, jnp.float32)
        l_scr[...] = jnp.zeros(l_scr.shape, jnp.float32)
        acc_scr[...] = jnp.zeros(acc_scr.shape, jnp.float32)

    # Skip compute for tiles strictly above the causal diagonal (their DMA is also elided by
    # the clamped kv index_map in the BlockSpec, so this re-reads an already-resident tile).
    @pl.when(k_start <= q_start + block_q - 1)
    def _compute():
        q = q_ref[0]                      # (H, Tq, hs)
        k = k_ref[0]                      # (H, Tk, hs)
        v = v_ref[0]                      # (H, Tk, hs)

        # Head-batched Q·K^T (scale already folded into Wq on the host).
        s = jnp.einsum("hqd,hkd->hqk", q, k,
                       preferred_element_type=jnp.float32)      # (H, Tq, Tk)

        # Only build/apply the causal mask on diagonal-straddling tiles.
        def _apply_mask(s_):
            q_pos = q_start + lax.broadcasted_iota(jnp.int32, (block_q, block_k), 0)
            k_pos = k_start + lax.broadcasted_iota(jnp.int32, (block_q, block_k), 1)
            return jnp.where((k_pos > q_pos)[None, :, :], jnp.float32(-1e30), s_)

        s = lax.cond(k_start + block_k - 1 > q_start, _apply_mask, lambda s_: s_, s)

        # Online softmax (all heads batched, f32 math).
        m_prev = m_scr[...]                                       # (H, Tq, 1)
        m_new = jnp.maximum(m_prev, jnp.max(s, axis=-1, keepdims=True))
        alpha = jnp.exp(m_prev - m_new)
        p = jnp.exp(s - m_new)                                    # (H, Tq, Tk) f32
        l_scr[...] = alpha * l_scr[...] + jnp.sum(p, axis=-1, keepdims=True)
        pv = jnp.einsum("hqk,hkd->hqd", p.astype(v.dtype), v,
                        preferred_element_type=jnp.float32)       # (H, Tq, hs)
        acc_scr[...] = alpha * acc_scr[...] + pv
        m_scr[...] = m_new

    @pl.when(ki == pl.num_programs(2) - 1)
    def _finalize():
        # Exact 1/l so the round(x*1e4)/1e4 output matches the reference semantics.
        out = acc_scr[...] * (1.0 / l_scr[...])                   # (H, Tq, hs)
        out = jnp.round(out * 10000.0) / 10000.0                  # torch.round(x*1e4)/1e4
        # Single lane-dense output store (head concat happens once per q-tile, not per kv step).
        o_ref[0] = jnp.concatenate(
            [out[h] for h in range(num_heads)], axis=-1
        ).astype(o_ref.dtype)


# ----------------------------------------------------------------------------
# Wrapper
# ----------------------------------------------------------------------------
def multi_headed_self_attention(embedded, wq, wk, wv, *, block_q=None, block_k=None,
                                matmul_dtype=jnp.bfloat16):
    """embedded: (B, T, E); wq/wk/wv: (H, E, head_size). Returns (B, T, H*head_size) f32."""
    B, T, E = embedded.shape
    H, _, hs = wq.shape
    A = H * hs
    vmem_limit = _vmem_limit_bytes()

    # Fuse heads into lane-dense (E, H*hs) weights; fold 1/sqrt(hs) into Wq; cast ONCE on host.
    scale = 1.0 / math.sqrt(hs)
    wq_f = jnp.transpose(wq, (1, 0, 2)).reshape(E, A) * scale
    wk_f = jnp.transpose(wk, (1, 0, 2)).reshape(E, A)
    wv_f = jnp.transpose(wv, (1, 0, 2)).reshape(E, A)
    w_qkv = jnp.concatenate([wq_f, wk_f, wv_f], axis=1).astype(matmul_dtype)  # (E, 3A)
    x = embedded.astype(matmul_dtype)

    # ---- hoisted fused QKV projection (Pallas) ----
    proj_t = _pick_block(T, 512)
    qkv = pl.pallas_call(
        _qkv_proj_kernel,
        out_shape=jax.ShapeDtypeStruct((B, T, 3 * A), matmul_dtype),
        grid_spec=pltpu.PrefetchScalarGridSpec(
            num_scalar_prefetch=0,
            grid=(B, T // proj_t),
            in_specs=[
                pl.BlockSpec((1, proj_t, E), lambda b, t: (b, t, 0)),
                pl.BlockSpec((E, 3 * A), lambda b, t: (0, 0)),   # constant weight block
            ],
            out_specs=pl.BlockSpec((1, proj_t, 3 * A), lambda b, t: (b, t, 0)),
        ),
        compiler_params=pltpu.CompilerParams(
            dimension_semantics=("parallel", "parallel"),
            vmem_limit_bytes=vmem_limit,
        ),
    )(x, w_qkv)

    # Head-major layouts (B, H, T, hs) so the attention kernel's per-head access is a free
    # leading-axis view and the dots are head-batched.  (Layout plumbing done once in XLA.)
    qkv = qkv.reshape(B, T, 3, H, hs)
    q_hm = jnp.transpose(qkv[:, :, 0], (0, 2, 1, 3))
    k_hm = jnp.transpose(qkv[:, :, 1], (0, 2, 1, 3))
    v_hm = jnp.transpose(qkv[:, :, 2], (0, 2, 1, 3))

    # Tile sizes: full T for toy shapes, 256x256 otherwise (safe for v7x's 64 MiB VMEM).
    if block_q is None:
        block_q = _pick_block(T, 256)
    if block_k is None:
        block_k = _pick_block(T, 256)
    assert T % block_q == 0 and T % block_k == 0
    # Ensure >= 2 parallel grid items so both v7x TensorCores get work.
    if B * (T // block_q) < 2 and block_q % 16 == 0:
        block_q //= 2

    num_kv = T // block_k

    def q_map(b, qi, ki):
        return (b, 0, qi, 0)

    def kv_map(b, qi, ki):
        # Clamp past-diagonal kv tiles to the last in-range block: repeated block index means
        # the pipeline issues no new DMA for causally-masked tiles (~2x kv HBM traffic saved).
        last_valid = ((qi + 1) * block_q - 1) // block_k
        return (b, 0, jnp.minimum(ki, last_valid), 0)

    def o_map(b, qi, ki):
        return (b, qi, 0)

    kernel = functools.partial(
        _flash_mhsa_kernel,
        block_q=block_q, block_k=block_k, num_heads=H, head_size=hs,
    )

    return pl.pallas_call(
        kernel,
        out_shape=jax.ShapeDtypeStruct((B, T, A), jnp.float32),
        grid_spec=pltpu.PrefetchScalarGridSpec(
            num_scalar_prefetch=0,
            grid=(B, T // block_q, num_kv),
            in_specs=[
                pl.BlockSpec((1, H, block_q, hs), q_map),
                pl.BlockSpec((1, H, block_k, hs), kv_map),
                pl.BlockSpec((1, H, block_k, hs), kv_map),
            ],
            out_specs=pl.BlockSpec((1, block_q, A), o_map),
            scratch_shapes=[
                pltpu.VMEM((H, block_q, 1), jnp.float32),    # running max per head
                pltpu.VMEM((H, block_q, 1), jnp.float32),    # running softmax denom per head
                pltpu.VMEM((H, block_q, hs), jnp.float32),   # output accumulator (head-major)
            ],
        ),
        compiler_params=pltpu.CompilerParams(
            dimension_semantics=("parallel", "parallel", "arbitrary"),
            vmem_limit_bytes=vmem_limit,
        ),
    )(q_hm, k_hm, v_hm)


# ----------------------------------------------------------------------------
# Deterministic init + pure-JAX reference
# ----------------------------------------------------------------------------
def _init_weights(embedding_dim, attention_dim, num_heads):
    """Mirrors the module structurally: every SingleHeadAttention re-seeds with
    torch.manual_seed(0), so all heads share identical K/Q/V weights; nn.Linear default
    init is U(-1/sqrt(in), 1/sqrt(in)).  (Exact torch RNG values are not reproducible.)"""
    head_size = attention_dim // num_heads
    bound = 1.0 / math.sqrt(embedding_dim)
    kk, kq, kv = jax.random.split(jax.random.PRNGKey(0), 3)
    wk1 = jax.random.uniform(kk, (embedding_dim, head_size), jnp.float32, -bound, bound)
    wq1 = jax.random.uniform(kq, (embedding_dim, head_size), jnp.float32, -bound, bound)
    wv1 = jax.random.uniform(kv, (embedding_dim, head_size), jnp.float32, -bound, bound)
    wk = jnp.broadcast_to(wk1[None], (num_heads, embedding_dim, head_size))
    wq = jnp.broadcast_to(wq1[None], (num_heads, embedding_dim, head_size))
    wv = jnp.broadcast_to(wv1[None], (num_heads, embedding_dim, head_size))
    return wq, wk, wv


def _reference(embedded, wq, wk, wv):
    """Pure-JAX reference of the PyTorch forward."""
    H, E, hs = wq.shape
    T = embedded.shape[1]
    outs = []
    for h in range(H):
        q = embedded @ wq[h]
        k = embedded @ wk[h]
        v = embedded @ wv[h]
        scores = jnp.einsum("btd,bsd->bts", q, k) / (hs ** 0.5)
        mask = jnp.triu(jnp.ones((T, T), bool), k=1)
        scores = jnp.where(mask[None], -jnp.inf, scores)
        attn = jax.nn.softmax(scores, axis=-1)
        outs.append(attn @ v)
    concat = jnp.concatenate(outs, axis=2)
    return jnp.round(concat * 10000.0) / 10000.0


if __name__ == "__main__":
    B, T = 2, 8
    embedding_dim, attention_dim, num_heads = 32, 16, 4

    key = jax.random.PRNGKey(0)
    embedded = jax.random.normal(key, (B, T, embedding_dim), jnp.float32)
    wq, wk, wv = _init_weights(embedding_dim, attention_dim, num_heads)

    ref = _reference(embedded, wq, wk, wv)

    # Default (bf16 MXU-operand) perf path: softmax math stays f32; loose bound for bf16 rounding.
    out_bf16 = multi_headed_self_attention(embedded, wq, wk, wv)
    out_bf16 = jax.block_until_ready(out_bf16)
    assert out_bf16.shape == (B, T, attention_dim), out_bf16.shape
    err_bf16 = float(jnp.max(jnp.abs(out_bf16 - ref)))
    assert err_bf16 <= 7.5e-2, err_bf16

    # f32 path: strict semantic check — at most one round(x*1e4)/1e4 quantization step of
    # disagreement from fp-order differences.
    out_f32 = multi_headed_self_attention(embedded, wq, wk, wv, matmul_dtype=jnp.float32)
    out_f32 = jax.block_until_ready(out_f32)
    assert out_f32.shape == (B, T, attention_dim), out_f32.shape
    err_f32 = float(jnp.max(jnp.abs(out_f32 - ref)))
    assert err_f32 <= 1.5e-4, err_f32

    print("KERNEL_OK")
</pallas_src>

<mosaic_0001>
module attributes {stable_mosaic.version = 11 : i64} {
  func.func @_qkv_proj_kernel(%arg0: i32, %arg1: i32, %arg2: memref<1x8x32xbf16, #tpu.memory_space<vmem>>, %arg3: memref<32x48xbf16, #tpu.memory_space<vmem>>, %arg4: memref<1x8x48xbf16, #tpu.memory_space<vmem>>) attributes {dimension_semantics = [#tpu.dimension_semantics<parallel>, #tpu.dimension_semantics<parallel>], iteration_bounds = array<i64: 2, 1>, scalar_prefetch = 0 : i64, scratch_operands = 0 : i64, tpu.core_type = #tpu.core_type<tc>, window_params = [{transform_indices = @transform_0, window_bounds = array<i64: 1, 8, 32>}, {pipeline_mode = #tpu.pipeline_mode<synchronous>, transform_indices = @transform_1, window_bounds = array<i64: 32, 48>}, {transform_indices = @transform_2, window_bounds = array<i64: 1, 8, 48>}]} {
    %c0 = arith.constant 0 : index
    %c0_0 = arith.constant 0 : index
    %c0_1 = arith.constant 0 : index
    %0 = vector.load %arg2[%c0, %c0_0, %c0_1] : memref<1x8x32xbf16, #tpu.memory_space<vmem>>, vector<1x8x32xbf16>
    %1 = vector.shape_cast %0 : vector<1x8x32xbf16> to vector<8x32xbf16>
    %c0_2 = arith.constant 0 : index
    %c0_3 = arith.constant 0 : index
    %2 = vector.load %arg3[%c0_2, %c0_3] : memref<32x48xbf16, #tpu.memory_space<vmem>>, vector<32x48xbf16>
    %cst = arith.constant dense<0.000000e+00> : vector<8x48xf32>
    %3 = tpu.matmul %1, %2, %cst {dimension_numbers = #tpu.dot_dimension_numbers<[1], [0], [0], [1], [0, 0, 1, 1], [], []>} : vector<8x32xbf16>, vector<32x48xbf16>, vector<8x48xf32> -> vector<8x48xf32>
    %4 = arith.truncf %3 : vector<8x48xf32> to vector<8x48xbf16>
    %c0_4 = arith.constant 0 : index
    %c0_5 = arith.constant 0 : index
    %c0_6 = arith.constant 0 : index
    %5 = vector.load %arg4[%c0_4, %c0_5, %c0_6] : memref<1x8x48xbf16, #tpu.memory_space<vmem>>, vector<1x8x48xbf16>
    %6 = vector.shape_cast %5 : vector<1x8x48xbf16> to vector<8x48xbf16>
    %7 = vector.shape_cast %4 : vector<8x48xbf16> to vector<1x8x48xbf16>
    tpu.vector_store %arg4[%c0_4, %c0_5, %c0_6], %7 {strides = array<i32>} : memref<1x8x48xbf16, #tpu.memory_space<vmem>>, vector<1x8x48xbf16>,
    return
  }
  func.func @transform_0(%arg0: i32, %arg1: i32) -> (i32, i32, i32) {
    %c0_i32 = arith.constant 0 : i32
    %c0_i32_0 = arith.constant 0 : i32
    return %arg0, %arg1, %c0_i32 : i32, i32, i32
  }
  func.func @transform_1(%arg0: i32, %arg1: i32) -> (i32, i32) {
    %c0_i32 = arith.constant 0 : i32
    %c0_i32_0 = arith.constant 0 : i32
    %c0_i32_1 = arith.constant 0 : i32
    return %c0_i32, %c0_i32_0 : i32, i32
  }
  func.func @transform_2(%arg0: i32, %arg1: i32) -> (i32, i32, i32) {
    %c0_i32 = arith.constant 0 : i32
    %c0_i32_0 = arith.constant 0 : i32
    return %arg0, %arg1, %c0_i32 : i32, i32, i32
  }
}

</mosaic_0001>

<bundles_post_ra>
// kernel: tpu_custom_call.1
= control target key start
LH: loop header
LB: loop body
LE: loop exit
PB: predicated region body
PF: predicated region fallthrough
CT: control target
= control target key end

     0   :  { %7 = vsyncpa [#allocation3], 0  ;;  %s851_s0 = inlined_call_operand.hbm [shape: bf16[2,8,32], index: 0, kind: input, shape index: {}]   ;;  %s852_s1 = inlined_call_operand.hbm [shape: bf16[32,48], index: 1, kind: input, shape index: {}]   ;;  %s853_s2 = inlined_call_operand.hbm [shape: bf16[2,8,48], index: 2, kind: output, shape index: {}]  }
   0x1   :  { %9 = vsyncpa [#allocation3 + $0x1], 0 }
   0x2   :  { %10 = vsyncpa [#allocation6], 0 }
   0x3   :  { %11 = vsyncpa [#allocation4], 0 }
   0x4   :  { %13 = vsyncpa [#allocation4 + $0x1], 0  ;;  %s637_s9 = smov 0   ;;  %s639_s10 = smov 0  }
   0x5   :  { %s641_s11 = smov 0   ;;  %s643_s12 = smov 0  }
   0x6   :  { %s645_s13 = smov 0   ;;  %s647_s14 = smov 0  }
   0x7 LB: > { %s361_s15 = sadd.s32 4294967295, %s613_s14   ;;  %s362_s16 = sadd.s32 4294967294, %s613_s14   ;;  %s613_s14 = sphi %s647_s14, %s19_s14   ;;  %s609_s13 = sphi %s645_s13, %s877_s13   ;;  %s605_s12 = sphi %s643_s12, %s876_s12   ;;  %s601_s11 = sphi %s641_s11, %s875_s11   ;;  %s597_s10 = sphi %s639_s10, %s874_s10   ;;  %s593_s9 = sphi %s637_s9, %s873_s9  }
   0x8   : > { %p53_p0 = scmp.ne.s32.totalorder %s597_s10, %s593_s9  ;;  %p671_p1 = scmp.eq.s32.totalorder %s361_s15, 0 }
   0x9   : > { %p675_p2 = scmp.eq.s32.totalorder %s361_s15, 1  ;;  %p106_p3 = scmp.eq.s32.totalorder %s362_s16, 1 }
   0xa   : > { %s858_s17 = scalar_select %p671_p1, 1, 0 }
   0xb   : > { %s859_s18 = scalar_select %p675_p2, 1, 0 }
   0xc   : > { %p681_p4 = por %p671_p1, %p53_p0  ;;  %p363_p5 = scmp.ge.s32.totalorder %s613_s14, 1 }
   0xd   : > { %p686_p6 = por %p106_p3, %p53_p0  ;;  %p113_p7 = scmp.lt.s32.totalorder %s613_s14, 3 }
   0xe   : > { %s860_s19 = scalar_select %p681_p4, 1, 0 }
   0xf   : > { %s861_s20 = scalar_select %p686_p6, 1, 0 }
  0x10   : > { %p691_p8 = pnand %p363_p5, %p113_p7  ;;  %s615_s22 = smov [#allocation5]  }
  0x11   : > { %s125_s23 = sshll.u32 %s615_s22, 4  ;;  %s31_s25 = sadd.s32 1, %s609_s13  ;;  %s126_s23 = int_to_ptr.vmem [resolvable:$true] %s125_s23 }
  0x12   : > { %s862_s21 = scalar_select %p691_p8, 1, 0 }
  0x13   : > { %p398_p9 = pneg %p691_p8  ;;  %s469_s28 = scalar_lea.hbm %s852_s1, 256 }
  0x14   : > { %p470_p12 = scmp.ne.s32.totalorder %s852_s1, %s469_s28  ;;  %p476_p5 = scmp.lt.u32.totalorder %s469_s28, %s852_s1 }
  0x15   : > { %p700_p11 = pnand %p398_p9, %p671_p1 }
  0x17   : > { %p471_p13 = pneg %p700_p11 }
  0x19   : > { %p472_p0 = pnand %p471_p13, %p470_p12 }
  0x1b   : > { %p473_p3 = pneg %p472_p0 }
  0x1d   : > { %p478_p7 = pnand %p476_p5, %p473_p3 }
  0x1f   : > { %481 = shalt.err (!%p478_p7)
}
  0x20   : > { %s482_s5 = scalar_lea.vmem %s126_s23, 256  ;;  %p490_p1 = scmp.lt.s32.totalorder %s126_s23, %s126_s23 }
  0x21   : > { %p483_p9 = scmp.ne.s32.totalorder %s126_s23, %s482_s5  ;;  %p491_p4 = scmp.lt.s32.totalorder %s482_s5, %s482_s5 }
  0x23   : > { %p485_p10 = pnand %p483_p9, %p471_p13  ;;  %p492_p8 = por %p491_p4, %p490_p1 }
  0x25   : > { %p486_p6 = pneg %p485_p10 }
  0x27   : > { %p493_p2 = pnand %p492_p8, %p486_p6 }
  0x29   : > { %496 = shalt.err (!%p493_p2)
}
  0x2a   : > { %s616_s6 = smov 64   ;;  %s617_s7 = smov 4  }
  0x2b   : > { %401 = dma.hbm_to_vmem [thread:$0]  (!%p700_p11), %s852_s1, 256, %s126_s23, [#allocation6], %s616_s6, %s616_s6, %s617_s7  }
  0x2c   : > { %p33_p1 = scmp.ge.s32.totalorder %s31_s25, 2  ;;  %s40_s16 = sadd.s32 1, %s601_s11 }
  0x2d   : > { %p47_p2 = scmp.ne.s32.totalorder %s601_s11, %s597_s10  ;;  %p48_p4 = scmp.eq.s32.totalorder %s613_s14, 0 }
  0x2e   : > { %s879_s25 = smov (%p33_p1, %s31_s25), 0  ;;  %p865_p8 = scmp.ne.s32.totalorder %s859_s18, 0 }
  0x2f   : > { %p727_p6 = por %p48_p4, %p47_p2  ;;  %s35_s24 = ssub.s32 %s609_s13, %s879_s25 }
  0x30   : > { %p733_p10 = por %p865_p8, %p47_p2  ;;  %p411_p12 = scmp.lt.s32.totalorder %s613_s14, 2 }
  0x31   : > { %p38_p11 = scmp.eq.s32.totalorder %s35_s24, 0  ;;  %s139_s23 = sand.u32 1, %s601_s11  }
  0x32   : > { %s366_s27 = sshll.u32 %s139_s23, 2  ;;  %s367_s29 = sshll.u32 %s609_s13, 6 }
  0x33   : > { %s742_s28 = scalar_select %p38_p11, %s601_s11, %s40_s16  }
  0x34   : > { %s748_s4 = scalar_lea.hbm %s851_s0, %s367_s29  ;;  %s143_s18 = scalar_lea.vmem [#allocation2], %s366_s27 }
  0x35   : > { %s151_s5 = sshll.u32 %s143_s18, 4  ;;  %p754_p13 = pnand %p411_p12, %p727_p6  ;;  %s750_s5 = int_to_ptr.vmem [resolvable:$true] %s151_s5 }
  0x36   : > { %s140_s7 = scalar_lea.sflag [#allocation3], %s139_s23  ;;  %s497_s8 = scalar_lea.hbm %s748_s4, 64 }
  0x37   : > { %p498_p0 = scmp.ne.s32.totalorder %s748_s4, %s497_s8  ;;  %p499_p3 = pneg %p754_p13 }
  0x38   : > { %s502_s24 = scalar_lea.hbm %s851_s0, 128  ;;  %p503_p9 = scmp.lt.u32.totalorder %s748_s4, %s851_s0 }
  0x39   : > { %p500_p5 = pnand %p499_p3, %p498_p0  ;;  %p504_p1 = scmp.lt.u32.totalorder %s502_s24, %s497_s8 }
  0x3a   : > { %p506_p4 = scmp.lt.u32.totalorder %s497_s8, %s748_s4 }
  0x3b   : > { %p501_p7 = pneg %p500_p5  ;;  %p505_p2 = por %p504_p1, %p503_p9 }
  0x3d   : > { %p507_p6 = por %p506_p4, %p505_p2 }
  0x3f   : > { %p508_p8 = pnand %p507_p6, %p501_p7 }
  0x41   : > { %511 = shalt.err (!%p508_p8)
}
  0x42   : > { %s512_s23 = scalar_lea.vmem %s750_s5, 64  ;;  %s618_s29 = smov [#allocation2]  }
  0x43   : > { %p513_p12 = scmp.ne.s32.totalorder %s750_s5, %s512_s23  ;;  %s517_s30 = sshll.u32 %s618_s29, 4  ;;  %s518_s30 = int_to_ptr.vmem [resolvable:$false] %s517_s30 }
  0x44   : > { %s519_s3 = scalar_lea.vmem %s518_s30, 128  ;;  %p520_p5 = scmp.lt.s32.totalorder %s750_s5, %s518_s30 }
  0x45   : > { %p515_p11 = pnand %p513_p12, %p499_p3  ;;  %p521_p9 = scmp.lt.s32.totalorder %s519_s3, %s512_s23 }
  0x47   : > { %p516_p0 = pneg %p515_p11  ;;  %p522_p1 = por %p521_p9, %p520_p5 }
  0x49   : > { %p523_p2 = pnand %p522_p1, %p516_p0 }
  0x4b   : > { %526 = shalt.err (!%p523_p2)
}
  0x4c   : > { %405 = dma.hbm_to_vmem [thread:$0]  (!%p754_p13), %s748_s4, 64, %s750_s5, %s140_s7  }
  0x4d   : > { %p868_p7 = scmp.ne.s32.totalorder %s862_s21, 0 }
  0x4e   : > { %s786_s18 = sand.u32 (!%p868_p7), 1, %s597_s10   ;;  %p869_p3 = scmp.ne.s32.totalorder (!%p868_p7), %s860_s19, 0 }
  0x4f   : > { %160 = sbr.rel (%p868_p7) target bundleno = 327 (0x147), region = 28  ;;  %s369_s8 = sshll.u32 (!%p868_p7), %s786_s18, 2 }
  0x50   : > { %s163_s15 = scalar_lea.sflag (!%p868_p7), [#allocation3], %s786_s18  ;;  %s166_s16 = scalar_lea.vmem (!%p868_p7), [#allocation2], %s369_s8 }
  0x56   : > { %580 = dma.done.wait (%p869_p3), %s163_s15, 64  }
  0x57   : > { %582 = vsyncadd (%p869_p3), %s163_s15, 4294967232  ;;  %p870_p4 = scmp.ne.s32.totalorder %s858_s17, 0 }
  0x59   : > { %584 = dma.done.wait (%p870_p4), [#allocation6], 256  }
  0x5a   : > { %586 = vsyncadd (%p870_p4), [#allocation6], 4294967040  ;;  %v619_v0 = vmov 0.0   ;;  %vm620_vm0 = vmmov 0   ;;  %v467_v1 = vld [vmem:[#allocation5] sm:$0xff]   ;;  %v468_v2 = vld [vmem:[#allocation5 + $0x8] sm:$0xff]  }
  0x5b   : > { %382 = vmatprep.subr.bf16.mxu0 %v619_v0  ;;  %386 = vmatprep.mubr.msk.bf16.mxu0 %vm620_vm0, %v619_v0  ;;  %v192_v3 = vld [vmem:[%s166_s16] sm:$0xf]  ;;  %vm209_vm1 = vcmask 261120   ;;  %s376_s19 = sshll.u32 %s605_s12, 6  ;;  %s190_s21 = scalar_lea.vmem [#allocation7], %s369_s8  ;;  %vm254_vm2 = vcmask 388096  }
  0x5c   : > { %383 = vmatpush3.bf16.msra.mxu0 %v467_v1  ;;  %s271_s4 = sshll.u32 %s190_s21, 4  ;;  %s802_s6 = scalar_lea.hbm %s853_s2, %s376_s19  ;;  %s804_s4 = int_to_ptr.vmem [resolvable:$true] %s271_s4 }
  0x5d   : > { %384 = vmatprep.subr.bf16.mxu0 %v619_v0  ;;  %s257_s12 = scalar_lea.sflag [#allocation4], %s786_s18  ;;  %s527_s7 = scalar_lea.vmem %s804_s4, 64 }
  0x5e   : > { %p528_p13 = scmp.ne.s32.totalorder %s804_s4, %s527_s7  ;;  %s621_s24 = smov [#allocation7]  }
  0x5f   : > { %s531_s22 = sshll.u32 %s621_s24, 4  ;;  %s532_s22 = int_to_ptr.vmem [resolvable:$false] %s531_s22 }
  0x60   : > { %385 = vmatpush3.bf16.msra.mxu0 %v468_v2  ;;  %p529_p6 = pnand %p528_p13, %p733_p10  ;;  %s533_s27 = scalar_lea.vmem %s532_s22, 128 }
  0x61   : > { %p534_p12 = scmp.lt.s32.totalorder %s804_s4, %s532_s22  ;;  %p535_p11 = scmp.lt.s32.totalorder %s533_s27, %s527_s7 }
  0x62   : > { %p530_p8 = pneg %p529_p6 }
  0x63   : > { %387 = vmatmul.mubr.msk.bf16.vlgmr.msra.gmra.mrb[0].mxu0 %vm209_vm1, %v192_v3  ;;  %p536_p0 = por %p535_p11, %p534_p12 }
  0x65   : > { %p537_p5 = pnand %p536_p0, %p530_p8 }
 0x136   : > { %v247_v4 = vpop.f32.mrb[0].mxu0 }
 0x137   : > { %v253_v5 = vpack.c.bf16 %v247_v4, %v247_v4  ;;  %v388_v6 = vpop.f32.mrb[1].mxu0 }
 0x138   : > { %v250_v7 = vpop.f32.mrb[2].mxu0 }
 0x139   : > { %v389_v8 = vpop.f32.mrb[3].mxu0  ;;  %255 = vst.msk [vmem:[%s190_s21] sm:$0xf] %vm254_vm2, %v253_v5 }
 0x13a   : > { %540 = shalt.err (!%p537_p5)
}
 0x13b   : > { %s541_s23 = scalar_lea.hbm %s802_s6, 64  ;;  %s545_s3 = scalar_lea.hbm %s853_s2, 128 }
 0x13c   : > { %p542_p9 = scmp.ne.s32.totalorder %s802_s6, %s541_s23  ;;  %p546_p7 = scmp.lt.u32.totalorder %s802_s6, %s853_s2 }
 0x13d   : > { %p547_p3 = scmp.lt.u32.totalorder %s545_s3, %s541_s23  ;;  %p549_p13 = scmp.lt.u32.totalorder %s541_s23, %s802_s6 }
 0x13e   : > { %p543_p1 = pnand %p542_p9, %p733_p10 }
 0x13f   : > { %p548_p4 = por %p547_p3, %p546_p7 }
 0x140   : > { %p544_p2 = pneg %p543_p1 }
 0x141   : > { %p550_p6 = por %p549_p13, %p548_p4 }
 0x143   : > { %p551_p8 = pnand %p550_p6, %p544_p2 }
 0x145   : > { %554 = shalt.err (!%p551_p8)
}
 0x146   : > { %396 = dma.vmem_to_hbm [thread:$0]  (%p733_p10), %s804_s4, 64, %s802_s6, %s257_s12  }
 0x147 PF: > { %s283_s15 = sand.u32 1, %s593_s9   ;;  %p871_p12 = scmp.ne.s32.totalorder %s861_s20, 0 }
 0x148   : > { %p872_p11 = scmp.ge.s32.totalorder %s613_s14, 2  ;;  %s284_s16 = scalar_lea.sflag [#allocation4], %s283_s15 }
 0x14a   : > { %p407_p0 = pnand %p872_p11, %p871_p12 }
 0x14c   : > { %588 = dma.done.wait (!%p407_p0), %s284_s16, 64  }
 0x14d   : > { %590 = vsyncadd (!%p407_p0), %s284_s16, 4294967232  ;;  %s19_s14 = sadd.s32 1, %s613_s14   ;;  %s873_s9 = smov %s597_s10 }
 0x14e   : > { %p16_p5 = scmp.ge.s32.totalorder %s19_s14, 4   ;;  %s874_s10 = smov %s601_s11 }
 0x14f   : > { %s875_s11 = smov %s742_s28  ;;  %s876_s12 = smov %s609_s13 }
 0x150   : > { %s877_s13 = smov %s879_s25  ;;  %18 = sbr.rel (!%p16_p5) target bundleno = 7 (0x7), region = 77 }
 0x157   :  { %289 = vsyncpa [#allocation3], 1 }
 0x158   :  { %291 = vsyncpa [#allocation3 + $0x1], 1 }
 0x159   :  { %292 = vsyncpa [#allocation6], 1 }
 0x15a   :  { %293 = vsyncpa [#allocation4], 1 }
 0x15b   :  { %295 = vsyncpa [#allocation4 + $0x1], 1 }

</bundles_post_ra>
